<compile_context>
chip_gen: v7x
topology: tpu7x:2x2x1
jax: 0.10.0
libtpu: 0.0.40
codegen_flags: <defaults>
</compile_context>

<pallas_src>
import jax
import jax.numpy as jnp
from jax.experimental import pallas as pl
from jax.experimental.pallas import tpu as pltpu

LANE = 128


def decoder_kernel(x_ref, wt_ref, b_ref, logits_ref, probs_ref):
    # MXU matmul (K=10, single pass) + bias add (VPU) + sigmoid (EUP).
    # The binding resource is the two HBM output streams, so both output
    # tiles are kept lane-dense (last dim 896 = 7*128).
    x = x_ref[...]                                        # (TB, 10) f32
    logits = jnp.dot(x, wt_ref[...], preferred_element_type=jnp.float32)
    logits = logits + b_ref[...]                          # (TB, 896) f32
    logits_ref[...] = logits
    probs_ref[...] = jax.nn.sigmoid(logits).astype(probs_ref.dtype)  # bf16


def prepare_decoder_params(w, b):
    """One-time (init-time) param prep: transpose + lane-pad 784 -> 896.

    w: (784, 10) PyTorch-layout Linear weight.  b: (784,).
    Returns w_t_pad (10, 896) f32 and b_pad (1, 896) f32.
    """
    out_features, in_features = w.shape
    out_pad = pl.cdiv(out_features, LANE) * LANE          # 896
    w_t_pad = jnp.zeros((in_features, out_pad), jnp.float32)
    w_t_pad = w_t_pad.at[:, :out_features].set(jnp.transpose(w).astype(jnp.float32))
    b_pad = jnp.zeros((1, out_pad), jnp.float32)
    b_pad = b_pad.at[:, :out_features].set(b.astype(jnp.float32))
    return w_t_pad, b_pad


def decoder_forward(x, w_t_pad, b_pad, out_features=784, max_tile=512):
    """x: (B, 10) f32.  w_t_pad: (10, 896) f32.  b_pad: (1, 896) f32.

    Returns (logits (B,1,28,28) f32, probs (B,1,28,28) bf16).
    """
    B, in_features = x.shape
    out_pad = w_t_pad.shape[1]

    # Batch tile: multiple of 16 (covers f32 8-sublane and bf16 16-sublane
    # packing), capped at 512 rows so double-buffered output tiles stay a few
    # MiB (safe everywhere, including v7x's 64 MiB VMEM).
    TB = min(max_tile, pl.cdiv(B, 16) * 16)
    Bp = pl.cdiv(B, TB) * TB
    if Bp != B:
        x = jnp.pad(x, ((0, Bp - B), (0, 0)))

    grid = (Bp // TB,)

    logits_pad, probs_pad = pl.pallas_call(
        decoder_kernel,
        out_shape=(
            jax.ShapeDtypeStruct((Bp, out_pad), jnp.float32),
            jax.ShapeDtypeStruct((Bp, out_pad), jnp.bfloat16),
        ),
        grid=grid,
        in_specs=[
            pl.BlockSpec((TB, in_features), lambda i: (i, 0)),        # batch tile
            pl.BlockSpec((in_features, out_pad), lambda i: (0, 0)),   # resident
            pl.BlockSpec((1, out_pad), lambda i: (0, 0)),             # resident
        ],
        out_specs=(
            pl.BlockSpec((TB, out_pad), lambda i: (i, 0)),
            pl.BlockSpec((TB, out_pad), lambda i: (i, 0)),
        ),
        compiler_params=pltpu.CompilerParams(
            dimension_semantics=("parallel",),
        ),
    )(x, w_t_pad, b_pad)

    # Slice off batch / lane padding, then reshape to the PyTorch NCHW event
    # shape outside the kernel (28 is not lane-aligned; keep the kernel flat).
    logits = logits_pad[:B, :out_features].reshape(B, 1, 28, 28)
    probs = probs_pad[:B, :out_features].reshape(B, 1, 28, 28)
    return logits, probs


def reference_forward(x, w, b):
    logits = x @ w.T + b
    B = x.shape[0]
    return (
        logits.reshape(B, 1, 28, 28),
        jax.nn.sigmoid(logits).reshape(B, 1, 28, 28),
    )


if __name__ == "__main__":
    key = jax.random.PRNGKey(0)
    k_x, k_w, k_b = jax.random.split(key, 3)

    B, IN, OUT = 8, 10, 784

    # Deterministic init mimicking nn.Linear default:
    # uniform(-1/sqrt(in_features), 1/sqrt(in_features))
    bound = 1.0 / jnp.sqrt(jnp.float32(IN))
    w = jax.random.uniform(k_w, (OUT, IN), jnp.float32, -bound, bound)
    b = jax.random.uniform(k_b, (OUT,), jnp.float32, -bound, bound)
    x = jax.random.normal(k_x, (B, IN), jnp.float32)

    # One-time parameter prep (transpose + lane padding) outside the hot path.
    w_t_pad, b_pad = prepare_decoder_params(w, b)

    logits, probs = decoder_forward(x, w_t_pad, b_pad)
    jax.block_until_ready((logits, probs))

    ref_logits, ref_probs = reference_forward(x, w, b)
    assert logits.shape == (B, 1, 28, 28)
    assert probs.shape == (B, 1, 28, 28)
    assert logits.dtype == jnp.float32
    assert probs.dtype == jnp.bfloat16
    assert jnp.allclose(logits, ref_logits, atol=1e-4, rtol=1e-4)
    # probs are bf16 (intentional: halves output store traffic); compare at
    # bf16 precision (~2^-8 relative, probs in [0, 1]).
    assert jnp.allclose(probs.astype(jnp.float32), ref_probs, atol=1e-2, rtol=1e-2)

    print("KERNEL_OK")
</pallas_src>

<mosaic_0001>
module attributes {stable_mosaic.version = 11 : i64} {
  func.func @decoder_kernel(%arg0: i32, %arg1: memref<16x10xf32, #tpu.memory_space<vmem>>, %arg2: memref<10x896xf32, #tpu.memory_space<vmem>>, %arg3: memref<1x896xf32, #tpu.memory_space<vmem>>, %arg4: memref<16x896xf32, #tpu.memory_space<vmem>>, %arg5: memref<16x896xbf16, #tpu.memory_space<vmem>>) attributes {dimension_semantics = [#tpu.dimension_semantics<parallel>], iteration_bounds = array<i64: 1>, scalar_prefetch = 0 : i64, scratch_operands = 0 : i64, tpu.core_type = #tpu.core_type<tc>, window_params = [{transform_indices = @transform_0, window_bounds = array<i64: 16, 10>}, {pipeline_mode = #tpu.pipeline_mode<synchronous>, transform_indices = @transform_1, window_bounds = array<i64: 10, 896>}, {pipeline_mode = #tpu.pipeline_mode<synchronous>, transform_indices = @transform_2, window_bounds = array<i64: 1, 896>}, {transform_indices = @transform_3, window_bounds = array<i64: 16, 896>}, {transform_indices = @transform_4, window_bounds = array<i64: 16, 896>}]} {
    %c0 = arith.constant 0 : index
    %c0_0 = arith.constant 0 : index
    %0 = vector.load %arg1[%c0, %c0_0] : memref<16x10xf32, #tpu.memory_space<vmem>>, vector<16x10xf32>
    %c0_1 = arith.constant 0 : index
    %c0_2 = arith.constant 0 : index
    %1 = vector.load %arg2[%c0_1, %c0_2] : memref<10x896xf32, #tpu.memory_space<vmem>>, vector<10x896xf32>
    %cst = arith.constant dense<0.000000e+00> : vector<16x896xf32>
    %2 = tpu.matmul %0, %1, %cst {dimension_numbers = #tpu.dot_dimension_numbers<[1], [0], [0], [1], [0, 0, 1, 1], [], []>} : vector<16x10xf32>, vector<10x896xf32>, vector<16x896xf32> -> vector<16x896xf32>
    %c0_3 = arith.constant 0 : index
    %c0_4 = arith.constant 0 : index
    %3 = vector.load %arg3[%c0_3, %c0_4] : memref<1x896xf32, #tpu.memory_space<vmem>>, vector<1x896xf32>
    %4 = vector.broadcast %3 : vector<1x896xf32> to vector<16x896xf32>
    %5 = arith.addf %2, %4 : vector<16x896xf32>
    %c0_5 = arith.constant 0 : index
    %c0_6 = arith.constant 0 : index
    %6 = vector.load %arg4[%c0_5, %c0_6] : memref<16x896xf32, #tpu.memory_space<vmem>>, vector<16x896xf32>
    tpu.vector_store %arg4[%c0_5, %c0_6], %5 {strides = array<i32>} : memref<16x896xf32, #tpu.memory_space<vmem>>, vector<16x896xf32>,
    %7 = arith.negf %5 : vector<16x896xf32>
    %8 = math.exp %7 : vector<16x896xf32>
    %cst_7 = arith.constant 1.000000e+00 : f32
    %9 = vector.broadcast %cst_7 : f32 to vector<16x896xf32>
    %10 = arith.addf %9, %8 : vector<16x896xf32>
    %11 = arith.divf %9, %10 : vector<16x896xf32>
    %12 = arith.truncf %11 : vector<16x896xf32> to vector<16x896xbf16>
    %c0_8 = arith.constant 0 : index
    %c0_9 = arith.constant 0 : index
    %13 = vector.load %arg5[%c0_8, %c0_9] : memref<16x896xbf16, #tpu.memory_space<vmem>>, vector<16x896xbf16>
    tpu.vector_store %arg5[%c0_8, %c0_9], %12 {strides = array<i32>} : memref<16x896xbf16, #tpu.memory_space<vmem>>, vector<16x896xbf16>,
    return
  }
  func.func @transform_0(%arg0: i32) -> (i32, i32) {
    %c0_i32 = arith.constant 0 : i32
    %c0_i32_0 = arith.constant 0 : i32
    return %arg0, %c0_i32 : i32, i32
  }
  func.func @transform_1(%arg0: i32) -> (i32, i32) {
    %c0_i32 = arith.constant 0 : i32
    %c0_i32_0 = arith.constant 0 : i32
    %c0_i32_1 = arith.constant 0 : i32
    return %c0_i32, %c0_i32_0 : i32, i32
  }
  func.func @transform_2(%arg0: i32) -> (i32, i32) {
    %c0_i32 = arith.constant 0 : i32
    %c0_i32_0 = arith.constant 0 : i32
    %c0_i32_1 = arith.constant 0 : i32
    return %c0_i32, %c0_i32_0 : i32, i32
  }
  func.func @transform_3(%arg0: i32) -> (i32, i32) {
    %c0_i32 = arith.constant 0 : i32
    %c0_i32_0 = arith.constant 0 : i32
    return %arg0, %c0_i32 : i32, i32
  }
  func.func @transform_4(%arg0: i32) -> (i32, i32) {
    %c0_i32 = arith.constant 0 : i32
    %c0_i32_0 = arith.constant 0 : i32
    return %arg0, %c0_i32 : i32, i32
  }
}

</mosaic_0001>

<bundles_post_ra>
// kernel: tpu_custom_call.1
= control target key start
LH: loop header
LB: loop body
LE: loop exit
PB: predicated region body
PF: predicated region fallthrough
CT: control target
= control target key end

     0   :  { %10 = vsyncpa [#allocation3], 0  ;;  %s984_s0 = inlined_call_operand.hbm [shape: f32[16,10], index: 0, kind: input, shape index: {}]   ;;  %s985_s1 = inlined_call_operand.hbm [shape: f32[10,896], index: 1, kind: input, shape index: {}]   ;;  %s986_s2 = inlined_call_operand.vmem [shape: f32[1,896], index: 2, kind: input, shape index: {}]   ;;  %s987_s3 = inlined_call_operand.hbm [shape: f32[16,896], index: 3, kind: output, shape index: {0}]   ;;  %s988_s4 = inlined_call_operand.hbm [shape: bf16[16,896], index: 4, kind: output, shape index: {1}]  }
   0x1   :  { %11 = vsyncpa [#allocation6], 0 }
   0x2   :  { %12 = vsyncpa [#allocation4], 0 }
   0x3   :  { %13 = vsyncpa [#allocation9], 0  ;;  %s862_s15 = smov [#allocation2]   ;;  %s766_s19 = scalar_lea.hbm %s984_s0, 256 }
   0x4   :  { %s19_s16 = sshll.u32 %s862_s15, 4  ;;  %p767_p0 = scmp.ne.s32.totalorder %s984_s0, %s766_s19  ;;  %s20_s16 = int_to_ptr.vmem [resolvable:$true] %s19_s16 }
   0x5   :  { %p770_p1 = scmp.lt.u32.totalorder %s766_s19, %s984_s0 }
   0x7   :  { %p772_p2 = pnand %p770_p1, %p767_p0 }
   0x9   :  { %775 = shalt.err (!%p772_p2)
}
   0xa   :  { %s776_s24 = scalar_lea.vmem %s20_s16, 256  ;;  %p781_p4 = scmp.lt.s32.totalorder %s20_s16, %s20_s16 }
   0xb   :  { %p777_p3 = scmp.ne.s32.totalorder %s20_s16, %s776_s24  ;;  %p782_p5 = scmp.lt.s32.totalorder %s776_s24, %s776_s24 }
   0xd   :  { %p783_p6 = por %p782_p5, %p781_p4 }
   0xf   :  { %p784_p7 = pnand %p783_p6, %p777_p3 }
  0x11   :  { %787 = shalt.err (!%p784_p7)
}
  0x12   :  { %s863_s25 = smov 128   ;;  %s864_s26 = smov 8  }
  0x13   :  { %25 = dma.hbm_to_vmem [thread:$0]  %s984_s0, 256, %s20_s16, [#allocation3], %s863_s25, %s863_s25, %s864_s26  }
  0x14   :  { %s865_s29 = smov [#allocation5]   ;;  %s788_s7 = scalar_lea.hbm %s985_s1, 1792 }
  0x15   :  { %s31_s30 = sshll.u32 %s865_s29, 4  ;;  %p789_p8 = scmp.ne.s32.totalorder %s985_s1, %s788_s7  ;;  %s32_s30 = int_to_ptr.vmem [resolvable:$true] %s31_s30 }
  0x16   :  { %p792_p9 = scmp.lt.u32.totalorder %s788_s7, %s985_s1 }
  0x18   :  { %p794_p10 = pnand %p792_p9, %p789_p8 }
  0x1a   :  { %797 = shalt.err (!%p794_p10)
}
  0x1b   :  { %s798_s12 = scalar_lea.vmem %s32_s30, 1792  ;;  %p803_p12 = scmp.lt.s32.totalorder %s32_s30, %s32_s30 }
  0x1c   :  { %p799_p11 = scmp.ne.s32.totalorder %s32_s30, %s798_s12  ;;  %p804_p13 = scmp.lt.s32.totalorder %s798_s12, %s798_s12 }
  0x1e   :  { %p805_p0 = por %p804_p13, %p803_p12 }
  0x20   :  { %p806_p1 = pnand %p805_p0, %p799_p11 }
  0x22   :  { %809 = shalt.err (!%p806_p1)
}
  0x23   :  { %s866_s0 = smov 896   ;;  %s867_s13 = smov 56  }
  0x24   :  { %37 = dma.hbm_to_vmem [thread:$0]  %s985_s1, 1792, %s32_s30, [#allocation6], %s866_s0, %s866_s0, %s867_s13  }
  0x25   :  { %854 = dma.done.wait [#allocation3], 256  }
  0x26   :  { %855 = vsyncadd [#allocation3], 4294967040 }
  0x27   :  { %856 = dma.done.wait [#allocation6], 1792  }
  0x28   :  { %857 = vsyncadd [#allocation6], 4294965504  ;;  %v868_v0 = vmov 0.0   ;;  %vm106_vm0 = vcmask 1041408   ;;  %vm869_vm1 = vmmov 1   ;;  %v49_v2 = vld [vmem:[#allocation5 + $0x8] sm:$0xff]  ;;  %v64_v25 = vlaneseq }
  0x29   :  { %192 = vmatprep.mubr.f32.mxu0 %v868_v0  ;;  %269 = vmatprep.mubr.f32.mxu1 %v868_v0  ;;  %vm926_vm2 = vmpackc.low %vm106_vm0, %vm869_vm1  ;;  %v56_v3 = vld [vmem:[#allocation5 + $0x40] sm:$0x3]  ;;  %v55_v6 = vld [vmem:[#allocation5 + $0x38] sm:$0x3]  ;;  %vm99_vm3 = vcmask 80896  }
  0x2a   :  { %v48_v4 = vld [vmem:[#allocation5] sm:$0xff]  ;;  %v674_v5 = vpack.c.bf16 %v56_v3, %v49_v2  ;;  %v51_v7 = vld [vmem:[#allocation5 + $0x18] sm:$0xff]  ;;  %v58_v9 = vld [vmem:[#allocation5 + $0x50] sm:$0x3]  ;;  %v65_v26 = vshrl.u32 %v64_v25, 7 }
  0x2b   :  { %v677_v8 = vpack.c.bf16 %v55_v6, %v48_v4  ;;  %v53_v10 = vld [vmem:[#allocation5 + $0x28] sm:$0xff]  ;;  %v60_v11 = vld [vmem:[#allocation5 + $0x60] sm:$0x3]  ;;  %v680_v12 = vpack.c.bf16 %v58_v9, %v51_v7  ;;  %v50_v14 = vld [vmem:[#allocation5 + $0x10] sm:$0xff] }
  0x2c   :  { %676 = vmatprep.subr.msk.bf16.mxu0 %vm926_vm2, %v674_v5  ;;  %v686_v13 = vpack.c.bf16 %v60_v11, %v53_v10  ;;  %v57_v15 = vld [vmem:[#allocation5 + $0x48] sm:$0x3]  ;;  %v52_v16 = vld [vmem:[#allocation5 + $0x20] sm:$0xff]  ;;  %v46_v17 = vld [vmem:[#allocation2] sm:$0xff]  ;;  %v66_v27 = vsub.s32 0, %v65_v26  ;;  %v70_v29 = vsub.s32 1, %v65_v26 }
  0x2d   :  { %679 = vmatpush1.bf16.msk.msra.mxu0 %vm926_vm2, %v677_v8  ;;  %v683_v18 = vpack.c.bf16 %v57_v15, %v50_v14  ;;  %v59_v19 = vld [vmem:[#allocation5 + $0x58] sm:$0x3]  ;;  %v54_v20 = vld [vmem:[#allocation5 + $0x30] sm:$0xff]  ;;  %682 = vmatprep.subr.msk.bf16.mxu1 %vm926_vm2, %v680_v12  ;;  %v61_v22 = vld [vmem:[#allocation5 + $0x68] sm:$0x3]  ;;  %v74_v30 = vsub.s32 2, %v65_v26 }
  0x2e   :  { %688 = vmatprep.subr.msk.bf16.mxu0 %vm926_vm2, %v686_v13  ;;  %v689_v21 = vpack.c.bf16 %v59_v19, %v52_v16  ;;  %v692_v23 = vpack.c.bf16 %v61_v22, %v54_v20  ;;  %v47_v24 = vld [vmem:[#allocation2 + $0x8] sm:$0xff]  ;;  %v62_v28 = vld [vmem:[%s986_s2] sm:$0xff]  ;;  %v78_v31 = vsub.s32 3, %v65_v26  ;;  %v82_v39 = vsub.s32 4, %v65_v26  ;;  %s870_s2 = smov [#allocation7]  }
  0x2f   :  { %685 = vmatpush1.bf16.msk.msra.mxu1 %vm926_vm2, %v683_v18  ;;  %v67_v32 = vrot.slane %v62_v28, %v66_v27  ;;  %v71_v33 = vrot.slane %v62_v28, %v70_v29  ;;  %v75_v34 = vrot.slane %v62_v28, %v74_v30  ;;  %v86_v42 = vsub.s32 5, %v65_v26  ;;  %s589_s17 = sshll.u32 %s870_s2, 4  ;;  %s590_s17 = int_to_ptr.vmem [resolvable:$true] %s589_s17 }
  0x30   :  { %620 = vmatmul.mubr.msk.f32.vlgmr.msra.gmra.mrb[0].mxu0 %vm99_vm3, %v46_v17  ;;  %694 = vmatprep.subr.msk.bf16.mxu1 %vm926_vm2, %v692_v23  ;;  %v79_v36 = vrot.slane %v62_v28, %v78_v31  ;;  %v90_v46 = vsub.s32 6, %v65_v26  ;;  %v83_v53 = vrot.slane %v62_v28, %v82_v39  ;;  %s810_s18 = scalar_lea.vmem %s590_s17, 1792  ;;  %p815_p3 = scmp.lt.s32.totalorder %s590_s17, %s590_s17 }
  0x31   :  { %691 = vmatpush1.bf16.msk.msra.mxu0 %vm926_vm2, %v689_v21  ;;  %198 = vmatprep.mubr.f32.mxu0 %v868_v0  ;;  %v87_v57 = vrot.slane %v62_v28, %v86_v42  ;;  %p811_p2 = scmp.ne.s32.totalorder %s590_s17, %s810_s18  ;;  %p816_p4 = scmp.lt.s32.totalorder %s810_s18, %s810_s18 }
  0x32   :  { %624 = vmatmul.mubr.msk.f32.vlgmr.msra.gmra.mrb[0].mxu1 %vm99_vm3, %v46_v17  ;;  %v91_v61 = vrot.slane %v62_v28, %v90_v46 }
  0x33   :  { %697 = vmatpush3.bf16.msk.msra.mxu1 %vm926_vm2, %v692_v23  ;;  %275 = vmatprep.mubr.f32.mxu1 %v868_v0  ;;  %p817_p5 = por %p816_p4, %p815_p3 }
  0x34   :  { %621 = vmatmul.mubr.msk.f32.gmra.mrb[2].mxu0 %vm99_vm3, %v47_v24 }
  0x35   :  { %346 = vmatprep.mubr.f32.mxu0 %v868_v0  ;;  %p818_p6 = pnand %p817_p5, %p811_p2 }
  0x36   :  { %625 = vmatmul.mubr.msk.f32.gmra.mrb[2].mxu1 %vm99_vm3, %v47_v24 }
  0x37   :  { %671 = vmatprep.mubr.msk.f32.mxu1 %vm99_vm3, %v46_v17 }
  0x38   :  { %628 = vmatmul.mubr.msk.f32.vlgmr.msra.gmra.mrb[4].mxu0 %vm99_vm3, %v46_v17 }
  0x39   :  { %352 = vmatprep.mubr.f32.mxu0 %v868_v0 }
  0x3a   :  { %672 = vmatmul.mubr.msk.f32.vlgmr.msra.gmra.mrb[4].mxu1 %vm99_vm3, %v47_v24 }
  0x3c   :  { %629 = vmatmul.mubr.msk.f32.gmra.mrb[6].mxu0 %vm99_vm3, %v47_v24 }
 0x103   :  { %v194_v35 = vpop.f32.mrb[0].mxu0 }
 0x104   :  { %v195_v37 = vadd.f32 %v194_v35, %v67_v32  ;;  %v196_v38 = vpop.f32.mrb[1].mxu0 }
 0x105   :  { %v197_v40 = vadd.f32 %v196_v38, %v71_v33  ;;  %v271_v41 = vpop.f32.mrb[0].mxu1 }
 0x106   :  { %434 = vst [vmem:[#allocation7] sm:$0xff] %v195_v37  ;;  %v633_v43 = vmul.f32 -1.442695, %v195_v37  ;;  %v272_v44 = vadd.f32 %v271_v41, %v75_v34  ;;  %v273_v45 = vpop.f32.mrb[1].mxu1 }
 0x107   :  { %435 = vst [vmem:[#allocation7 + $0x8] sm:$0xff] %v197_v40  ;;  %v634_v47 = vmul.f32 -1.442695, %v197_v40  ;;  %v200_v48 = vpop.f32.mrb[2].mxu0  ;;  %v274_v49 = vadd.f32 %v273_v45, %v79_v36 }
 0x108   :  { %710 = vpow2.f32 %v633_v43  ;;  %v201_v50 = vadd.f32 %v200_v48, %v67_v32  ;;  %436 = vst [vmem:[#allocation7 + $0x10] sm:$0xff] %v272_v44  ;;  %v635_v51 = vmul.f32 -1.442695, %v272_v44  ;;  %v202_v52 = vpop.f32.mrb[3].mxu0 }
 0x109   :  { %712 = vpow2.f32 %v634_v47  ;;  %v203_v54 = vadd.f32 %v202_v52, %v71_v33  ;;  %437 = vst [vmem:[#allocation7 + $0x18] sm:$0xff] %v274_v49  ;;  %v636_v55 = vmul.f32 -1.442695, %v274_v49  ;;  %v277_v56 = vpop.f32.mrb[2].mxu1 }
 0x10a   :  { %441 = vst [vmem:[#allocation7 + $0x38] sm:$0xff] %v201_v50  ;;  %v640_v58 = vmul.f32 -1.442695, %v201_v50  ;;  %714 = vpow2.f32 %v635_v51  ;;  %v278_v59 = vadd.f32 %v277_v56, %v75_v34  ;;  %v279_v60 = vpop.f32.mrb[3].mxu1 }
 0x10b   :  { %442 = vst [vmem:[#allocation7 + $0x40] sm:$0xff] %v203_v54  ;;  %v641_v62 = vmul.f32 -1.442695, %v203_v54  ;;  %716 = vpow2.f32 %v636_v55  ;;  %v348_v63 = vpop.f32.mrb[4].mxu0  ;;  %v280_v0 = vadd.f32 %v279_v60, %v79_v36 }
 0x10c   :  { %718 = vpow2.f32 %v640_v58  ;;  %443 = vst [vmem:[#allocation7 + $0x48] sm:$0xff] %v278_v59  ;;  %v642_v1 = vmul.f32 -1.442695, %v278_v59  ;;  %v349_v2 = vadd.f32 %v348_v63, %v83_v53  ;;  %v350_v3 = vpop.f32.mrb[5].mxu0 }
 0x10d   :  { %720 = vpow2.f32 %v641_v62  ;;  %444 = vst [vmem:[#allocation7 + $0x50] sm:$0xff] %v280_v0  ;;  %v643_v4 = vmul.f32 -1.442695, %v280_v0  ;;  %v351_v5 = vadd.f32 %v350_v3, %v87_v57  ;;  %v673_v6 = vpop.f32.mrb[4].mxu1 }
 0x10e   :  { %722 = vpow2.f32 %v642_v1  ;;  %438 = vst [vmem:[#allocation7 + $0x20] sm:$0xff] %v349_v2  ;;  %v637_v7 = vmul.f32 -1.442695, %v349_v2  ;;  %v431_v8 = vadd.f32 %v673_v6, %v91_v61  ;;  %v425_v9 = vpop.f32.mrb[5].mxu1 }
 0x10f   :  { %724 = vpow2.f32 %v643_v4  ;;  %439 = vst [vmem:[#allocation7 + $0x28] sm:$0xff] %v351_v5  ;;  %v638_v10 = vmul.f32 -1.442695, %v351_v5  ;;  %v354_v11 = vpop.f32.mrb[6].mxu0  ;;  %v426_v12 = vadd.f32 %v425_v9, %v91_v61 }
 0x110   :  { %726 = vpow2.f32 %v637_v7  ;;  %v355_v13 = vadd.f32 %v354_v11, %v83_v53  ;;  %447 = vst [vmem:[#allocation7 + $0x68] sm:$0xff] %v431_v8  ;;  %v646_v14 = vmul.f32 -1.442695, %v431_v8  ;;  %v356_v15 = vpop.f32.mrb[7].mxu0 }
 0x111   :  { %728 = vpow2.f32 %v638_v10  ;;  %v357_v16 = vadd.f32 %v356_v15, %v87_v57  ;;  %440 = vst [vmem:[#allocation7 + $0x30] sm:$0xff] %v426_v12  ;;  %v639_v17 = vmul.f32 -1.442695, %v426_v12 }
 0x112   :  { %v711_v18 = vpop.eup %710  ;;  %445 = vst [vmem:[#allocation7 + $0x58] sm:$0xff] %v355_v13  ;;  %v644_v19 = vmul.f32 -1.442695, %v355_v13  ;;  %730 = vpow2.f32 %v646_v14 }
 0x113   :  { %v713_v20 = vpop.eup %712  ;;  %v490_v21 = vadd.f32 1.0, %v711_v18  ;;  %446 = vst [vmem:[#allocation7 + $0x60] sm:$0xff] %v357_v16  ;;  %732 = vpow2.f32 %v639_v17 }
 0x114   :  { %v715_v22 = vpop.eup %714  ;;  %v491_v23 = vadd.f32 1.0, %v713_v20  ;;  %734 = vpow2.f32 %v644_v19 }
 0x115   :  { %821 = shalt.err (!%p818_p6)
}
 0x116   :  { %s822_s21 = scalar_lea.hbm %s987_s3, 1792 }
 0x117   :  { %p823_p7 = scmp.ne.s32.totalorder %s987_s3, %s822_s21  ;;  %p826_p8 = scmp.lt.u32.totalorder %s822_s21, %s987_s3 }
 0x119   :  { %p828_p9 = pnand %p826_p8, %p823_p7 }
 0x11b   :  { %831 = shalt.err (!%p828_p9)
}
 0x11c   :  { %595 = dma.vmem_to_hbm [thread:$0]  %s590_s17, 1792, %s987_s3, [#allocation4], %s866_s0, %s866_s0, %s867_s13   ;;  %v717_v24 = vpop.eup %716  ;;  %736 = vrcp.f32 %v490_v21  ;;  %v492_v25 = vadd.f32 1.0, %v715_v22  ;;  %v645_v40 = vmul.f32 -1.442695, %v357_v16 }
 0x11d   :  { %v719_v26 = vpop.eup %718  ;;  %738 = vrcp.f32 %v491_v23  ;;  %v493_v27 = vadd.f32 1.0, %v717_v24  ;;  %s871_s3 = smov [#allocation8]  }
 0x11e   :  { %v721_v28 = vpop.eup %720  ;;  %v497_v29 = vadd.f32 1.0, %v719_v26  ;;  %740 = vrcp.f32 %v492_v25  ;;  %s601_s28 = sshll.u32 %s871_s3, 4  ;;  %s602_s28 = int_to_ptr.vmem [resolvable:$true] %s601_s28 }
 0x11f   :  { %v723_v30 = vpop.eup %722  ;;  %v498_v31 = vadd.f32 1.0, %v721_v28  ;;  %742 = vrcp.f32 %v493_v27  ;;  %s832_s29 = scalar_lea.vmem %s602_s28, 896  ;;  %p837_p11 = scmp.lt.s32.totalorder %s602_s28, %s602_s28 }
 0x120   :  { %v725_v32 = vpop.eup %724  ;;  %744 = vrcp.f32 %v497_v29  ;;  %v499_v33 = vadd.f32 1.0, %v723_v30  ;;  %p833_p10 = scmp.ne.s32.totalorder %s602_s28, %s832_s29  ;;  %p838_p12 = scmp.lt.s32.totalorder %s832_s29, %s832_s29 }
 0x121   :  { %v727_v34 = vpop.eup %726  ;;  %746 = vrcp.f32 %v498_v31  ;;  %v500_v35 = vadd.f32 1.0, %v725_v32 }
 0x122   :  { %v729_v36 = vpop.eup %728  ;;  %748 = vrcp.f32 %v499_v33  ;;  %v494_v37 = vadd.f32 1.0, %v727_v34  ;;  %p839_p13 = por %p838_p12, %p837_p11 }
 0x123   :  { %v731_v38 = vpop.eup %730  ;;  %750 = vrcp.f32 %v500_v35  ;;  %v495_v39 = vadd.f32 1.0, %v729_v36 }
 0x124   :  { %v733_v41 = vpop.eup %732  ;;  %752 = vrcp.f32 %v494_v37  ;;  %v503_v42 = vadd.f32 1.0, %v731_v38  ;;  %p840_p0 = pnand %p839_p13, %p833_p10 }
 0x125   :  { %v735_v43 = vpop.eup %734  ;;  %754 = vrcp.f32 %v495_v39  ;;  %v496_v44 = vadd.f32 1.0, %v733_v41 }
 0x126   :  { %v737_v45 = vpop.eup %736  ;;  %756 = vrcp.f32 %v503_v42  ;;  %v501_v58 = vadd.f32 1.0, %v735_v43 }
 0x127   :  { %v739_v46 = vpop.eup %738  ;;  %758 = vpow2.f32 %v645_v40 }
 0x128   :  { %v741_v47 = vpop.eup %740  ;;  %v655_v48 = vpack.c.bf16 %v739_v46, %v737_v45  ;;  %760 = vrcp.f32 %v496_v44 }
 0x129   :  { %v743_v49 = vpop.eup %742  ;;  %762 = vrcp.f32 %v501_v58 }
 0x12a   :  { %v745_v50 = vpop.eup %744  ;;  %576 = vst [vmem:[#allocation8] sm:$0xff] %v655_v48  ;;  %v656_v51 = vpack.c.bf16 %v743_v49, %v741_v47 }
 0x12b   :  { %v747_v52 = vpop.eup %746 }
 0x12c   :  { %v749_v53 = vpop.eup %748  ;;  %v659_v54 = vpack.c.bf16 %v747_v52, %v745_v50  ;;  %577 = vst [vmem:[#allocation8 + $0x8] sm:$0xff] %v656_v51 }
 0x12d   :  { %v751_v55 = vpop.eup %750 }
 0x12e   :  { %v753_v56 = vpop.eup %752  ;;  %580 = vst [vmem:[#allocation8 + $0x1c] sm:$0xff] %v659_v54  ;;  %v660_v57 = vpack.c.bf16 %v751_v55, %v749_v53 }
 0x12f   :  { %v755_v59 = vpop.eup %754 }
 0x130   :  { %v757_v60 = vpop.eup %756  ;;  %581 = vst [vmem:[#allocation8 + $0x24] sm:$0xff] %v660_v57  ;;  %v657_v61 = vpack.c.bf16 %v755_v59, %v753_v56 }
 0x131   :  { %v759_v62 = vpop.eup %758  ;;  %v662_v63 = vpack.c.bf16 %v757_v60, %v757_v60 }
 0x132   :  { %578 = vst [vmem:[#allocation8 + $0x10] sm:$0xff] %v657_v61  ;;  %v502_v0 = vadd.f32 1.0, %v759_v62  ;;  %v761_v1 = vpop.eup %760 }
 0x133   :  { %583 = vst [vmem:[#allocation8 + $0x34] sm:$0xf] %v662_v63  ;;  %v658_v2 = vpack.c.bf16 %v761_v1, %v761_v1  ;;  %v763_v3 = vpop.eup %762 }
 0x134   :  { %764 = vrcp.f32 %v502_v0 }
 0x135   :  { %579 = vst [vmem:[#allocation8 + $0x18] sm:$0xf] %v658_v2 }
 0x13e   :  { %v765_v4 = vpop.eup %764 }
 0x13f   :  { %v661_v5 = vpack.c.bf16 %v765_v4, %v763_v3 }
 0x141   :  { %582 = vst [vmem:[#allocation8 + $0x2c] sm:$0xff] %v661_v5 }
 0x142   :  { %843 = shalt.err (!%p840_p0)
}
 0x143   :  { %s844_s6 = scalar_lea.hbm %s988_s4, 896 }
 0x144   :  { %p845_p1 = scmp.ne.s32.totalorder %s988_s4, %s844_s6  ;;  %p848_p2 = scmp.lt.u32.totalorder %s844_s6, %s988_s4 }
 0x146   :  { %p850_p3 = pnand %p848_p2, %p845_p1 }
 0x148   :  { %853 = shalt.err (!%p850_p3)
}
 0x149   :  { %s872_s11 = smov 448   ;;  %s873_s12 = smov 28  }
 0x14a   :  { %607 = dma.vmem_to_hbm [thread:$0]  %s602_s28, 896, %s988_s4, [#allocation9], %s872_s11, %s872_s11, %s873_s12  }
 0x14b   :  { %858 = dma.done.wait [#allocation4], 1792  }
 0x14c   :  { %859 = vsyncadd [#allocation4], 4294965504 }
 0x14d   :  { %860 = dma.done.wait [#allocation9], 896  }
 0x14e   :  { %861 = vsyncadd [#allocation9], 4294966400 }
 0x14f   :  { %614 = vsyncpa [#allocation3], 1 }
 0x150   :  { %615 = vsyncpa [#allocation6], 1 }
 0x151   :  { %616 = vsyncpa [#allocation4], 1 }
 0x152   :  { %617 = vsyncpa [#allocation9], 1 }

</bundles_post_ra>
